<compile_context>
chip_gen: v5e
topology: v5e:2x2
jax: 0.10.0
libtpu: 0.0.40
codegen_flags: <defaults>
</compile_context>

<pallas_src>
import functools

import jax
import jax.numpy as jnp
import numpy as np
from jax.experimental import pallas as pl
from jax.experimental.pallas import tpu as pltpu


# ----------------------------------------------------------------------------- kernel
def _dlinear_kernel(x_ref, w_ref, b_ref, o_ref):
    # x_ref: (bm, L)   w_ref: (L, H)   b_ref: (1, H)   o_ref: (bm, H)
    acc = jnp.dot(x_ref[...], w_ref[...], preferred_element_type=jnp.float32)
    o_ref[...] = (acc + b_ref[...]).astype(o_ref.dtype)


# ----------------------------------------------------------------------------- weight fold
def _moving_avg_matrix(seq_len, kernel_size):
    """Static [L, L] matrix M s.t. trend = M @ x (replicate-pad + AvgPool1d, stride 1)."""
    assert kernel_size % 2 == 1, "series_decomp assumes an odd moving_avg kernel"
    pad = (kernel_size - 1) // 2
    src = np.clip(np.arange(-pad, seq_len + pad), 0, seq_len - 1)
    m = np.zeros((seq_len, seq_len), np.float64)
    for t in range(seq_len):
        for j in range(kernel_size):
            m[t, src[t + j]] += 1.0 / kernel_size
    return m.astype(np.float32)


def fold_dlinear_weights(w_seasonal, b_seasonal, w_trend, b_trend, *, moving_avg):
    """One-time fold of series_decomp + both Linears into (W_eff^T, b_eff).

        out = Ws @ (x - M x) + Wt @ (M x) + bs + bt
            = [Ws + (Wt - Ws) @ M] @ x + (bs + bt)

    Returns W_eff^T of shape (L, H) (ready for the (B*C, L) @ (L, H) GEMM) and
    b_eff of shape (1, H).  Call once per weight update, not per forward.
    """
    H, L = w_seasonal.shape
    mavg = jnp.asarray(_moving_avg_matrix(L, moving_avg))                       # (L, L)
    w_eff = w_seasonal + jnp.dot(w_trend - w_seasonal, mavg,
                                 precision=jax.lax.Precision.HIGHEST)           # (H, L)
    b_eff = (b_seasonal + b_trend).reshape(1, H).astype(jnp.float32)            # (1, H)
    return w_eff.T, b_eff                                                        # (L, H), (1, H)


# ----------------------------------------------------------------------------- block sizing
def _choose_block_m(M, L, H, itemsize, block_budget_bytes=12 * 1024 * 1024):
    """Largest row-block that fits a conservative VMEM budget; aims for >= 2
    grid steps when M is big enough (keeps both v7x TensorCores busy)."""
    per_row = 2 * (L + H) * itemsize            # double-buffered x-block + out-block rows
    cap = max(8, (block_budget_bytes // per_row) // 8 * 8)
    if M <= 8:
        return M                                # one full-array block
    bm = ((-(-M // 2)) + 7) // 8 * 8            # ~half of M, rounded up to a sublane tile
    return max(8, min(bm, cap))


# ----------------------------------------------------------------------------- wrapper
@jax.jit
def dlinear_encoder(x_enc, w_eff_t, b_eff):
    """DLinear encoder / forecast.  x_enc: [B, L, C] -> [B, H, C] (x_enc dtype)."""
    B, L, C = x_enc.shape
    Lw, H = w_eff_t.shape
    assert Lw == L
    dtype = x_enc.dtype
    itemsize = jnp.dtype(dtype).itemsize

    # Lane-dense GEMM operand: rows = (batch, channel) pairs, contraction over time.
    x_rows = x_enc.transpose(0, 2, 1).reshape(B * C, L)

    M = B * C
    bm = _choose_block_m(M, L, H, itemsize)
    n_blk = -(-M // bm)
    M_pad = n_blk * bm
    if M_pad != M:
        x_rows = jnp.pad(x_rows, ((0, M_pad - M), (0, 0)))

    w_in = w_eff_t.astype(dtype)      # tiny, one-off cast; x stays untouched
    b_in = b_eff.astype(jnp.float32)

    # Per-step VMEM footprint: double-buffered x/out blocks + resident weight/bias.
    need = 2 * bm * (L + H) * itemsize + 2 * L * H * itemsize + 2 * H * 4
    vmem_limit = int(min(48 * 1024 * 1024, max(2 * need, 16 * 1024 * 1024)))

    out = pl.pallas_call(
        _dlinear_kernel,
        out_shape=jax.ShapeDtypeStruct((M_pad, H), dtype),
        grid_spec=pltpu.PrefetchScalarGridSpec(
            num_scalar_prefetch=0,
            grid=(n_blk,),
            in_specs=[
                pl.BlockSpec((bm, L), lambda i: (i, 0)),   # x rows block
                pl.BlockSpec((L, H), lambda i: (0, 0)),    # W_eff^T (constant)
                pl.BlockSpec((1, H), lambda i: (0, 0)),    # b_eff   (constant)
            ],
            out_specs=pl.BlockSpec((bm, H), lambda i: (i, 0)),
        ),
        compiler_params=pltpu.CompilerParams(
            dimension_semantics=("parallel",),
            vmem_limit_bytes=vmem_limit),
    )(x_rows, w_in, b_in)

    # (M, H) -> [B, C, H] -> [B, H, C]  (module's output layout)
    return out[:M].reshape(B, C, H).transpose(0, 2, 1)


def dlinear_forecast(x_enc, w_seasonal, b_seasonal, w_trend, b_trend, *, moving_avg):
    """Convenience one-shot path: fold weights then run the kernel."""
    w_eff_t, b_eff = fold_dlinear_weights(w_seasonal, b_seasonal, w_trend, b_trend,
                                          moving_avg=moving_avg)
    return dlinear_encoder(x_enc, w_eff_t, b_eff)


# ----------------------------------------------------------------------------- reference
def _reference(x_enc, w_s, b_s, w_t, b_t, moving_avg):
    """Pure-numpy (float64) replica of Model.forward, forecast / individual=False."""
    x = np.asarray(x_enc, dtype=np.float64)                  # [B, L, C]
    B, L, C = x.shape
    pad = (moving_avg - 1) // 2
    front = np.repeat(x[:, 0:1, :], pad, axis=1)
    back = np.repeat(x[:, -1:, :], pad, axis=1)
    xp = np.concatenate([front, x, back], axis=1)            # [B, L+2p, C]
    trend = np.stack([xp[:, j:j + L, :] for j in range(moving_avg)], 0).mean(0)
    seasonal = x - trend
    s = np.einsum('bcl,hl->bch', seasonal.transpose(0, 2, 1), np.asarray(w_s, np.float64)) \
        + np.asarray(b_s, np.float64)
    t = np.einsum('bcl,hl->bch', trend.transpose(0, 2, 1), np.asarray(w_t, np.float64)) \
        + np.asarray(b_t, np.float64)
    return (s + t).transpose(0, 2, 1)                        # [B, H, C]


# ----------------------------------------------------------------------------- demo
if __name__ == "__main__":
    batch = 2
    enc_in = 8        # channels
    seq_len = 16
    pred_len = 8      # hidden_len for forecast tasks
    moving_avg = 5    # odd kernel size (DLinear default is 25)

    key = jax.random.PRNGKey(0)
    k_x, k_ws, k_wt, k_bs, k_bt = jax.random.split(key, 5)

    x_enc = jax.random.normal(k_x, (batch, seq_len, enc_in), dtype=jnp.float32)

    # Weights start at the module's 1/seq_len init; small random perturbations
    # so the seasonal and trend branches differ and the weight fold is exercised.
    w_seasonal = (jnp.full((pred_len, seq_len), 1.0 / seq_len, jnp.float32)
                  + 0.05 * jax.random.normal(k_ws, (pred_len, seq_len), jnp.float32))
    w_trend = (jnp.full((pred_len, seq_len), 1.0 / seq_len, jnp.float32)
               + 0.05 * jax.random.normal(k_wt, (pred_len, seq_len), jnp.float32))
    bound = 1.0 / np.sqrt(seq_len)
    b_seasonal = jax.random.uniform(k_bs, (pred_len,), jnp.float32, -bound, bound)
    b_trend = jax.random.uniform(k_bt, (pred_len,), jnp.float32, -bound, bound)

    ref = _reference(x_enc, w_seasonal, b_seasonal, w_trend, b_trend, moving_avg)

    # Fold once (hoisted out of the forward path), then run the kernel.
    w_eff_t, b_eff = fold_dlinear_weights(w_seasonal, b_seasonal, w_trend, b_trend,
                                          moving_avg=moving_avg)
    out = dlinear_encoder(x_enc, w_eff_t, b_eff)
    out = jax.block_until_ready(out)

    assert out.shape == (batch, pred_len, enc_in)
    # Tolerance allows for the MXU executing f32 matmuls via bf16 passes; any
    # structural (layout/transpose) bug would produce O(1) errors and still fail.
    np.testing.assert_allclose(np.asarray(out), ref, rtol=1e-2, atol=1e-2)

    print("KERNEL_OK")
</pallas_src>

<mosaic_0001>
module attributes {stable_mosaic.version = 11 : i64} {
  func.func @_dlinear_kernel(%arg0: i32, %arg1: memref<8x16xf32, #tpu.memory_space<vmem>>, %arg2: memref<16x8xf32, #tpu.memory_space<vmem>>, %arg3: memref<1x8xf32, #tpu.memory_space<vmem>>, %arg4: memref<8x8xf32, #tpu.memory_space<vmem>>) attributes {dimension_semantics = [#tpu.dimension_semantics<parallel>], iteration_bounds = array<i64: 2>, scalar_prefetch = 0 : i64, scratch_operands = 0 : i64, tpu.core_type = #tpu.core_type<tc>, window_params = [{transform_indices = @transform_0, window_bounds = array<i64: 8, 16>}, {pipeline_mode = #tpu.pipeline_mode<synchronous>, transform_indices = @transform_1, window_bounds = array<i64: 16, 8>}, {pipeline_mode = #tpu.pipeline_mode<synchronous>, transform_indices = @transform_2, window_bounds = array<i64: 1, 8>}, {transform_indices = @transform_3, window_bounds = array<i64: 8, 8>}]} {
    %c0 = arith.constant 0 : index
    %c0_0 = arith.constant 0 : index
    %0 = vector.load %arg1[%c0, %c0_0] : memref<8x16xf32, #tpu.memory_space<vmem>>, vector<8x16xf32>
    %c0_1 = arith.constant 0 : index
    %c0_2 = arith.constant 0 : index
    %1 = vector.load %arg2[%c0_1, %c0_2] : memref<16x8xf32, #tpu.memory_space<vmem>>, vector<16x8xf32>
    %cst = arith.constant dense<0.000000e+00> : vector<8x8xf32>
    %2 = tpu.matmul %0, %1, %cst {dimension_numbers = #tpu.dot_dimension_numbers<[1], [0], [0], [1], [0, 0, 1, 1], [], []>} : vector<8x16xf32>, vector<16x8xf32>, vector<8x8xf32> -> vector<8x8xf32>
    %c0_3 = arith.constant 0 : index
    %c0_4 = arith.constant 0 : index
    %3 = vector.load %arg3[%c0_3, %c0_4] : memref<1x8xf32, #tpu.memory_space<vmem>>, vector<1x8xf32>
    %4 = vector.broadcast %3 : vector<1x8xf32> to vector<8x8xf32>
    %5 = arith.addf %2, %4 : vector<8x8xf32>
    %c0_5 = arith.constant 0 : index
    %c0_6 = arith.constant 0 : index
    %6 = vector.load %arg4[%c0_5, %c0_6] : memref<8x8xf32, #tpu.memory_space<vmem>>, vector<8x8xf32>
    tpu.vector_store %arg4[%c0_5, %c0_6], %5 {strides = array<i32>} : memref<8x8xf32, #tpu.memory_space<vmem>>, vector<8x8xf32>,
    return
  }
  func.func @transform_0(%arg0: i32) -> (i32, i32) {
    %c0_i32 = arith.constant 0 : i32
    %c0_i32_0 = arith.constant 0 : i32
    return %arg0, %c0_i32 : i32, i32
  }
  func.func @transform_1(%arg0: i32) -> (i32, i32) {
    %c0_i32 = arith.constant 0 : i32
    %c0_i32_0 = arith.constant 0 : i32
    %c0_i32_1 = arith.constant 0 : i32
    return %c0_i32, %c0_i32_0 : i32, i32
  }
  func.func @transform_2(%arg0: i32) -> (i32, i32) {
    %c0_i32 = arith.constant 0 : i32
    %c0_i32_0 = arith.constant 0 : i32
    %c0_i32_1 = arith.constant 0 : i32
    return %c0_i32, %c0_i32_0 : i32, i32
  }
  func.func @transform_3(%arg0: i32) -> (i32, i32) {
    %c0_i32 = arith.constant 0 : i32
    %c0_i32_0 = arith.constant 0 : i32
    return %arg0, %c0_i32 : i32, i32
  }
}

</mosaic_0001>

<bundles_post_ra>
// kernel: dlinear_encoder.1
= control target key start
LH: loop header
LB: loop body
LE: loop exit
PB: predicated region body
PF: predicated region fallthrough
CT: control target
= control target key end

     0   :  { %s299_s12 = smov 0   ;;  %s319_s0 = inlined_call_operand.vmem [shape: f32[16,16], index: 0, kind: input, shape index: {}]   ;;  %s320_s1 = inlined_call_operand.vmem [shape: f32[16,8], index: 1, kind: input, shape index: {}]   ;;  %s321_s2 = inlined_call_operand.vmem [shape: f32[1,8], index: 2, kind: input, shape index: {}]   ;;  %s322_s3 = inlined_call_operand.vmem [shape: f32[16,8], index: 3, kind: output, shape index: {}]  }
   0x1 LB: > { %s252_s13 = sadd.s32 4294967295, %s277_s12   ;;  %p256_p0 = scmp.ge.s32.totalorder %s277_s12, 1  ;;  %s277_s12 = sphi %s299_s12, %s13_s12  }
   0x2   : > { %p136_p1 = scmp.lt.s32.totalorder %s277_s12, 3 }
   0x4   : > { %p137_p2 = pnand %p256_p0, %p136_p1 }
   0x5   : > { %p158_p3 = scmp.lt.s32.totalorder (!%p137_p2), %s252_s13, 1 }
   0x6   : > { %140 = sbr.rel (%p137_p2) target bundleno = 144 (0x90), region = 32 }
   0xb   : > { %v168_v0 = vld [vmem:[%s320_s1 + $0x8] sm:$0xff]  ;;  %v167_v1 = vld [vmem:[%s320_s1] sm:$0xff]  ;;  %s324_s13 = smov (!%p158_p3, %s252_s13), 1  ;;  %vm173_vm0 = vcmask 130048   ;;  %vm197_vm1 = vcmask 64512  }
   0xc   : > { %191 = vmatpush.msra.mxu0 %v168_v0  ;;  %s257_s18 = sshll.u32 %s324_s13, 3  ;;  %v270_v3 = vld [vmem:[%s321_s2] ss:$0 sm:$0xff] }
   0xd   : > { %s161_s21 = scalar_lea.vmem %s319_s0, %s257_s18  ;;  %s165_s26 = scalar_lea.vmem %s322_s3, %s257_s18 }
   0xe   : > { %192 = vmatpush.msra.mxu0 %v167_v1  ;;  %v166_v2 = vld [vmem:[%s161_s21] sm:$0xff] }
   0xf   : > { %259 = vmatmul.msk.f32.vlgmr.msra.gmra.mxu0 %vm173_vm0, %v166_v2 }
  0x8c   : > { %v194_v4 = vpop.f32.mrf.mxu0 }
  0x8d   : > { %v195_v5 = vadd.f32 %v270_v3, %v194_v4 }
  0x8f   : > { %198 = vst.msk [vmem:[%s165_s26] sm:$0xff] %vm197_vm1, %v195_v5 }
  0x90 PF: > { %s13_s12 = sadd.s32 1, %s277_s12  }
  0x91   : > { %p10_p4 = scmp.ge.s32.totalorder %s13_s12, 4  }
  0x93   :  { %12 = sbr.rel (!%p10_p4) target bundleno = 1 (0x1), region = 62 }

</bundles_post_ra>
